<compile_context>
chip_gen: v5e
topology: v5e:2x2
jax: 0.10.0
libtpu: 0.0.40
codegen_flags: <defaults>
</compile_context>

<pallas_src>
import functools

import jax
import jax.numpy as jnp
from jax.experimental import pallas as pl
from jax.experimental.pallas import tpu as pltpu

_LANE = 128
_SUB = 8
_VMEM_LIMIT = 32 * 1024 * 1024

_KERNEL_FLOATS = (jnp.dtype(jnp.float32), jnp.dtype(jnp.bfloat16))


def _as_kernel_float(a):
    a = jnp.asarray(a)
    return a if a.dtype in _KERNEL_FLOATS else a.astype(jnp.float32)


def _pick_tile(n, align, cap):
    """Tile along a dim of size n: either n itself (single full-dim block, always
    legal) or a multiple of `align` (legal, ragged tail masked in-kernel)."""
    cap = max(align, (cap // align) * align)
    return n if n <= cap else cap


# ---------------------------------------------------------------------------
# Kernels (grid = (core_split, tiles_per_core), semantics = (parallel, arbitrary))
# ---------------------------------------------------------------------------
def _bce_kernel(x_ref, y_ref, out_ref, acc_ref, *, n_valid, tile_rows,
                tiles_per_core):
    """BCE-with-logits partial sums over a lane-dense (tile_rows, 128) tile."""
    c = pl.program_id(0)
    i = pl.program_id(1)

    @pl.when(i == 0)
    def _():
        acc_ref[...] = jnp.zeros_like(acc_ref)

    x = x_ref[...].astype(jnp.float32)
    y = y_ref[...].astype(jnp.float32)
    # Numerically stable BCE-with-logits.
    per = jnp.maximum(x, 0.0) - x * y + jnp.log1p(jnp.exp(-jnp.abs(x)))

    g = c * tiles_per_core + i                 # global tile index (unclamped)
    start = g * (tile_rows * _LANE)
    span = tile_rows * _LANE

    @pl.when(start + span <= n_valid)          # interior tile: no masking work
    def _():
        acc_ref[...] += jnp.sum(per, axis=0, keepdims=True)

    @pl.when(start + span > n_valid)           # ragged / duplicated (OOB) tile
    def _():
        row = jax.lax.broadcasted_iota(jnp.int32, per.shape, 0)
        lane = jax.lax.broadcasted_iota(jnp.int32, per.shape, 1)
        flat = start + row * _LANE + lane
        acc_ref[...] += jnp.sum(jnp.where(flat < n_valid, per, 0.0),
                                axis=0, keepdims=True)

    @pl.when(i == pl.num_programs(1) - 1)
    def _():
        r = jax.lax.broadcasted_iota(jnp.int32, out_ref.shape, 0)
        out_ref[...] = jnp.where(r == 0, acc_ref[...], 0.0)


def _ce_kernel_lanedense(x_ref, t_ref, out_ref, acc_ref, *, n_valid, tile_lanes,
                         tiles_per_core):
    """Cross-entropy partial sums, batch on lanes: x (C, TL), t (1, TL)."""
    c = pl.program_id(0)
    i = pl.program_id(1)

    @pl.when(i == 0)
    def _():
        acc_ref[...] = jnp.zeros_like(acc_ref)

    x = x_ref[...].astype(jnp.float32)               # (C, TL)
    t = t_ref[...]                                   # (1, TL) int32
    m = jnp.max(x, axis=0, keepdims=True)
    lse = m + jnp.log(jnp.sum(jnp.exp(x - m), axis=0, keepdims=True))
    cls = jax.lax.broadcasted_iota(jnp.int32, x.shape, 0)
    # NOTE: out-of-range labels silently pick 0 (PyTorch would error).
    picked = jnp.sum(jnp.where(cls == t, x, 0.0), axis=0, keepdims=True)
    per = lse - picked                               # (1, TL)

    g = c * tiles_per_core + i
    start = g * tile_lanes

    @pl.when(start + tile_lanes <= n_valid)
    def _():
        acc_ref[...] += jnp.sum(per, axis=1, keepdims=True)

    @pl.when(start + tile_lanes > n_valid)
    def _():
        lane = jax.lax.broadcasted_iota(jnp.int32, per.shape, 1)
        acc_ref[...] += jnp.sum(jnp.where(start + lane < n_valid, per, 0.0),
                                axis=1, keepdims=True)

    @pl.when(i == pl.num_programs(1) - 1)
    def _():
        r = jax.lax.broadcasted_iota(jnp.int32, out_ref.shape, 0)
        l = jax.lax.broadcasted_iota(jnp.int32, out_ref.shape, 1)
        out_ref[...] = jnp.where((r == 0) & (l == 0), acc_ref[...], 0.0)


def _ce_kernel_rowmajor(x_ref, t_ref, out_ref, acc_ref, *, n_valid, tile_rows,
                        tiles_per_core):
    """Cross-entropy partial sums, classes on lanes: x (TB, C), t (TB, 1)."""
    c = pl.program_id(0)
    i = pl.program_id(1)

    @pl.when(i == 0)
    def _():
        acc_ref[...] = jnp.zeros_like(acc_ref)

    x = x_ref[...].astype(jnp.float32)               # (TB, C)
    t = t_ref[...]                                   # (TB, 1) int32
    m = jnp.max(x, axis=1, keepdims=True)
    lse = m + jnp.log(jnp.sum(jnp.exp(x - m), axis=1, keepdims=True))
    cls = jax.lax.broadcasted_iota(jnp.int32, x.shape, 1)
    picked = jnp.sum(jnp.where(cls == t, x, 0.0), axis=1, keepdims=True)
    per = lse - picked                               # (TB, 1)

    g = c * tiles_per_core + i
    start = g * tile_rows

    @pl.when(start + tile_rows <= n_valid)
    def _():
        acc_ref[...] += jnp.sum(per, axis=0, keepdims=True)

    @pl.when(start + tile_rows > n_valid)
    def _():
        row = jax.lax.broadcasted_iota(jnp.int32, per.shape, 0)
        acc_ref[...] += jnp.sum(jnp.where(start + row < n_valid, per, 0.0),
                                axis=0, keepdims=True)

    @pl.when(i == pl.num_programs(1) - 1)
    def _():
        r = jax.lax.broadcasted_iota(jnp.int32, out_ref.shape, 0)
        l = jax.lax.broadcasted_iota(jnp.int32, out_ref.shape, 1)
        out_ref[...] = jnp.where((r == 0) & (l == 0), acc_ref[...], 0.0)


# ---------------------------------------------------------------------------
# pallas_call plumbing
# ---------------------------------------------------------------------------
def _grid_split(total_tiles):
    core_split = 2 if total_tiles >= 2 else 1
    tpc = pl.cdiv(total_tiles, core_split)
    return core_split, tpc


def _sum_loss_call(kernel, core_split, tpc, in_specs, inputs, acc_shape, cost,
                   n_valid):
    out = pl.pallas_call(
        kernel,
        out_shape=jax.ShapeDtypeStruct((_SUB * core_split, _LANE), jnp.float32),
        grid=(core_split, tpc),
        in_specs=in_specs,
        out_specs=pl.BlockSpec((_SUB, _LANE), lambda c, i: (c, 0)),
        scratch_shapes=[pltpu.VMEM(acc_shape, jnp.float32)],
        compiler_params=pltpu.CompilerParams(
            dimension_semantics=("parallel", "arbitrary"),
            vmem_limit_bytes=_VMEM_LIMIT),
        cost_estimate=cost,
    )(*inputs)
    # Combine the per-core partial sums and apply 1/B once (tiny XLA op).
    return jnp.sum(out) / n_valid


def _bce_forward(logits, target, tile_cap_rows=2048):
    x = _as_kernel_float(logits).reshape(-1)
    t = jnp.asarray(target).reshape(-1)
    if jnp.issubdtype(t.dtype, jnp.floating):
        y = _as_kernel_float(t)
    else:
        y = t.astype(jnp.bfloat16)          # 0/1 labels: exact, half the bytes
    B = x.shape[0]
    rows = pl.cdiv(B, _LANE)
    if B % _LANE == 0:
        x2 = x.reshape(rows, _LANE)         # free bitcast-reshape, no copy
        y2 = y.reshape(rows, _LANE)
    else:
        # Only non-128-aligned batches pay this one small copy (<128 pad elems).
        pad = rows * _LANE - B
        x2 = jnp.pad(x, (0, pad)).reshape(rows, _LANE)
        y2 = jnp.pad(y, (0, pad)).reshape(rows, _LANE)

    tile_rows = _pick_tile(rows, _SUB, tile_cap_rows)   # <= ~1 MiB f32 per input
    total_tiles = pl.cdiv(rows, tile_rows)
    core_split, tpc = _grid_split(total_tiles)
    max_blk = total_tiles - 1

    def im(c, i):
        return (jnp.minimum(c * tpc + i, max_blk), 0)

    in_specs = [pl.BlockSpec((tile_rows, _LANE), im),
                pl.BlockSpec((tile_rows, _LANE), im)]
    cost = pl.CostEstimate(
        flops=8 * B, transcendentals=2 * B,
        bytes_accessed=B * (x2.dtype.itemsize + y2.dtype.itemsize) + 4)
    kern = functools.partial(_bce_kernel, n_valid=B, tile_rows=tile_rows,
                             tiles_per_core=tpc)
    return _sum_loss_call(kern, core_split, tpc, in_specs, (x2, y2),
                          (1, _LANE), cost, B)


def _ce_forward(logits, target, lane_tile_cap=None, row_tile_cap=None):
    x = _as_kernel_float(logits)
    B, C = x.shape
    t = jnp.asarray(target).reshape(-1).astype(jnp.int32)
    isz = x.dtype.itemsize
    cost = pl.CostEstimate(flops=6 * B * C, transcendentals=B * C + B,
                           bytes_accessed=B * C * isz + B * 4 + 4)

    if C < _LANE:
        # Lane-dense layout: batch on the 128-lane axis, tiny class axis leading.
        # The transpose below is the one remaining extra HBM pass (kept wrapper-
        # side: a (tile, C<8) in-kernel XLU transpose has fragile lowering).
        x_t = x.T                                        # (C, B)
        t_r = t.reshape(1, B)
        cap = lane_tile_cap if lane_tile_cap is not None else \
            max(_LANE, (1 << 20) // (C * isz))           # ~1 MiB of logits/tile
        tile_lanes = _pick_tile(B, _LANE, cap)
        total_tiles = pl.cdiv(B, tile_lanes)
        core_split, tpc = _grid_split(total_tiles)
        max_blk = total_tiles - 1

        def im(c, i):
            return (0, jnp.minimum(c * tpc + i, max_blk))

        in_specs = [pl.BlockSpec((C, tile_lanes), im),
                    pl.BlockSpec((1, tile_lanes), im)]
        kern = functools.partial(_ce_kernel_lanedense, n_valid=B,
                                 tile_lanes=tile_lanes, tiles_per_core=tpc)
        return _sum_loss_call(kern, core_split, tpc, in_specs, (x_t, t_r),
                              (1, 1), cost, B)

    # C >= 128: classes already lane-dense; tile over batch rows, no pad/transpose.
    t_c = t.reshape(B, 1)
    cap = row_tile_cap if row_tile_cap is not None else \
        max(_SUB, (2 << 20) // (C * isz))                # ~2 MiB of logits/tile
    tile_rows = _pick_tile(B, _SUB, cap)
    total_tiles = pl.cdiv(B, tile_rows)
    core_split, tpc = _grid_split(total_tiles)
    max_blk = total_tiles - 1

    def im(c, i):
        return (jnp.minimum(c * tpc + i, max_blk), 0)

    in_specs = [pl.BlockSpec((tile_rows, C), im),
                pl.BlockSpec((tile_rows, 1), im)]
    kern = functools.partial(_ce_kernel_rowmajor, n_valid=B,
                             tile_rows=tile_rows, tiles_per_core=tpc)
    return _sum_loss_call(kern, core_split, tpc, in_specs, (x, t_c),
                          (1, 1), cost, B)


def base_classifier_criterium(logits, target, n_classes=2):
    """Equivalent of BaseClassifierCriterium.forward: scalar mean loss."""
    if n_classes == 2:
        return _bce_forward(logits, target)
    elif n_classes > 2:
        return _ce_forward(logits, target)
    raise ValueError("n_classes must be >= 2")


# ---------------------------------------------------------------------------
# Pure-JAX references (sanity check only)
# ---------------------------------------------------------------------------
def _ref_bce(logits, target):
    x = jnp.asarray(logits, jnp.float32).reshape(-1)
    y = jnp.asarray(target, jnp.float32).reshape(-1)
    return jnp.mean(jnp.maximum(x, 0.0) - x * y + jnp.log1p(jnp.exp(-jnp.abs(x))))


def _ref_ce(logits, target):
    x = jnp.asarray(logits, jnp.float32)
    t = jnp.asarray(target).reshape(-1).astype(jnp.int32)
    logp = jax.nn.log_softmax(x, axis=-1)
    return -jnp.mean(jnp.take_along_axis(logp, t[:, None], axis=-1))


if __name__ == "__main__":
    key = jax.random.PRNGKey(0)
    ks = jax.random.split(key, 12)
    tol = dict(atol=1e-3, rtol=1e-3)

    # 1) binary (n_classes == 2), tiny module-typical shapes
    B = 8
    lg = jax.random.normal(ks[0], (B, 1), dtype=jnp.float32)
    tg = jax.random.bernoulli(ks[1], 0.5, (B, 1)).astype(jnp.int32)
    out = base_classifier_criterium(lg, tg, n_classes=2)
    jax.block_until_ready(out)
    assert jnp.allclose(out, _ref_bce(lg, tg), **tol)

    # 2) binary, bf16 logits, 128-aligned batch, multi-tile + 2-core + OOB-clamp path
    B = 3072
    lg = jax.random.normal(ks[2], (B, 1), dtype=jnp.bfloat16)
    tg = jax.random.bernoulli(ks[3], 0.5, (B, 1)).astype(jnp.int32)
    out = _bce_forward(lg, tg, tile_cap_rows=8)
    jax.block_until_ready(out)
    assert jnp.allclose(out, _ref_bce(lg, tg), **tol)

    # 3) multi-class, small C (lane-dense kernel), tiny
    B, C = 8, 5
    lg = jax.random.normal(ks[4], (B, C), dtype=jnp.float32)
    tg = jax.random.randint(ks[5], (B, 1), 0, C)
    out = base_classifier_criterium(lg, tg, n_classes=C)
    jax.block_until_ready(out)
    assert jnp.allclose(out, _ref_ce(lg, tg), **tol)

    # 4) multi-class, small C, forced multi-tile (odd tile count, ragged tail)
    B, C = 600, 7
    lg = jax.random.normal(ks[6], (B, C), dtype=jnp.bfloat16)
    tg = jax.random.randint(ks[7], (B,), 0, C)
    out = _ce_forward(lg, tg, lane_tile_cap=128)
    jax.block_until_ready(out)
    assert jnp.allclose(out, _ref_ce(lg, tg), **tol)

    # 5) multi-class, C >= 128 (row-major kernel), tiny
    B, C = 8, 130
    lg = jax.random.normal(ks[8], (B, C), dtype=jnp.float32)
    tg = jax.random.randint(ks[9], (B, 1), 0, C)
    out = base_classifier_criterium(lg, tg, n_classes=C)
    jax.block_until_ready(out)
    assert jnp.allclose(out, _ref_ce(lg, tg), **tol)

    # 6) row-major kernel, forced multi-tile (odd tile count, ragged tail)
    B, C = 100, 133
    lg = jax.random.normal(ks[10], (B, C), dtype=jnp.bfloat16)
    tg = jax.random.randint(ks[11], (B,), 0, C)
    out = _ce_forward(lg, tg, row_tile_cap=16)
    jax.block_until_ready(out)
    assert jnp.allclose(out, _ref_ce(lg, tg), **tol)

    print("KERNEL_OK")
</pallas_src>

<mosaic_0001>
module attributes {stable_mosaic.version = 11 : i64} {
  func.func @_bce_kernel(%arg0: i32, %arg1: i32, %arg2: memref<1x128xf32, #tpu.memory_space<vmem>>, %arg3: memref<1x128xbf16, #tpu.memory_space<vmem>>, %arg4: memref<8x128xf32, #tpu.memory_space<vmem>>, %arg5: memref<1x128xf32, #tpu.memory_space<vmem>>) attributes {dimension_semantics = [#tpu.dimension_semantics<parallel>, #tpu.dimension_semantics<arbitrary>], iteration_bounds = array<i64: 1, 1>, scalar_prefetch = 0 : i64, scratch_operands = 1 : i64, tpu.core_type = #tpu.core_type<tc>, window_params = [{transform_indices = @transform_0, window_bounds = array<i64: 1, 128>}, {transform_indices = @transform_1, window_bounds = array<i64: 1, 128>}, {transform_indices = @transform_2, window_bounds = array<i64: 8, 128>}]} {
    %c0_i32 = arith.constant 0 : i32
    %0 = arith.cmpi eq, %arg1, %c0_i32 : i32
    %1 = arith.extui %0 : i1 to i32
    %c0_i32_0 = arith.constant 0 : i32
    %2 = arith.cmpi ne, %1, %c0_i32_0 : i32
    scf.if %2 {
      %cst_12 = arith.constant 0.000000e+00 : f32
      %30 = vector.broadcast %cst_12 : f32 to vector<1x128xf32>
      %c0_13 = arith.constant 0 : index
      %c0_14 = arith.constant 0 : index
      %31 = vector.load %arg5[%c0_13, %c0_14] : memref<1x128xf32, #tpu.memory_space<vmem>>, vector<1x128xf32>
      tpu.vector_store %arg5[%c0_13, %c0_14], %30 {strides = array<i32>} : memref<1x128xf32, #tpu.memory_space<vmem>>, vector<1x128xf32>,
    } else {
    }
    %c0 = arith.constant 0 : index
    %c0_1 = arith.constant 0 : index
    %3 = vector.load %arg2[%c0, %c0_1] : memref<1x128xf32, #tpu.memory_space<vmem>>, vector<1x128xf32>
    %c0_2 = arith.constant 0 : index
    %c0_3 = arith.constant 0 : index
    %4 = vector.load %arg3[%c0_2, %c0_3] : memref<1x128xbf16, #tpu.memory_space<vmem>>, vector<1x128xbf16>
    %5 = arith.extf %4 : vector<1x128xbf16> to vector<1x128xf32>
    %cst = arith.constant 0.000000e+00 : f32
    %6 = vector.broadcast %cst : f32 to vector<1x128xf32>
    %7 = arith.maximumf %3, %6 : vector<1x128xf32>
    %8 = arith.mulf %3, %5 : vector<1x128xf32>
    %9 = arith.subf %7, %8 : vector<1x128xf32>
    %10 = math.absf %3 : vector<1x128xf32>
    %cst_4 = arith.constant 0.000000e+00 : f32
    %11 = vector.broadcast %cst_4 : f32 to vector<1x128xf32>
    %12 = arith.subf %11, %10 : vector<1x128xf32>
    %13 = math.exp %12 : vector<1x128xf32>
    %14 = math.log1p %13 : vector<1x128xf32>
    %15 = arith.addf %9, %14 : vector<1x128xf32>
    %c1_i32 = arith.constant 1 : i32
    %16 = arith.muli %arg0, %c1_i32 : i32
    %17 = arith.addi %16, %arg1 : i32
    %c128_i32 = arith.constant 128 : i32
    %18 = arith.muli %17, %c128_i32 : i32
    %c128_i32_5 = arith.constant 128 : i32
    %19 = arith.addi %18, %c128_i32_5 : i32
    %c8_i32 = arith.constant 8 : i32
    %20 = arith.cmpi sle, %19, %c8_i32 : i32
    %21 = arith.extui %20 : i1 to i32
    %c0_i32_6 = arith.constant 0 : i32
    %22 = arith.cmpi ne, %21, %c0_i32_6 : i32
    scf.if %22 {
      %c0_12 = arith.constant 0 : index
      %c0_13 = arith.constant 0 : index
      %30 = vector.load %arg5[%c0_12, %c0_13] : memref<1x128xf32, #tpu.memory_space<vmem>>, vector<1x128xf32>
      %cst_14 = arith.constant dense<0.000000e+00> : vector<128xf32>
      %31 = vector.multi_reduction <add>, %15, %cst_14 [0] : vector<1x128xf32> to vector<128xf32>
      %32 = vector.shape_cast %31 : vector<128xf32> to vector<1x128xf32>
      %33 = arith.addf %30, %32 : vector<1x128xf32>
      %c0_15 = arith.constant 0 : index
      %c0_16 = arith.constant 0 : index
      %34 = vector.load %arg5[%c0_15, %c0_16] : memref<1x128xf32, #tpu.memory_space<vmem>>, vector<1x128xf32>
      tpu.vector_store %arg5[%c0_15, %c0_16], %33 {strides = array<i32>} : memref<1x128xf32, #tpu.memory_space<vmem>>, vector<1x128xf32>,
    } else {
    }
    %c128_i32_7 = arith.constant 128 : i32
    %23 = arith.addi %18, %c128_i32_7 : i32
    %c8_i32_8 = arith.constant 8 : i32
    %24 = arith.cmpi sgt, %23, %c8_i32_8 : i32
    %25 = arith.extui %24 : i1 to i32
    %c0_i32_9 = arith.constant 0 : i32
    %26 = arith.cmpi ne, %25, %c0_i32_9 : i32
    scf.if %26 {
      %30 = tpu.iota {dimensions = array<i32: 0>} : vector<1x128xi32>
      %31 = tpu.iota {dimensions = array<i32: 1>} : vector<1x128xi32>
      %c128_i32_12 = arith.constant 128 : i32
      %32 = vector.broadcast %c128_i32_12 : i32 to vector<1x128xi32>
      %33 = arith.muli %30, %32 : vector<1x128xi32>
      %34 = vector.broadcast %18 : i32 to vector<1x128xi32>
      %35 = arith.addi %34, %33 : vector<1x128xi32>
      %36 = arith.addi %35, %31 : vector<1x128xi32>
      %c0_13 = arith.constant 0 : index
      %c0_14 = arith.constant 0 : index
      %37 = vector.load %arg5[%c0_13, %c0_14] : memref<1x128xf32, #tpu.memory_space<vmem>>, vector<1x128xf32>
      %c8_i32_15 = arith.constant 8 : i32
      %38 = vector.broadcast %c8_i32_15 : i32 to vector<1x128xi32>
      %39 = arith.cmpi slt, %36, %38 : vector<1x128xi32>
      %cst_16 = arith.constant 0.000000e+00 : f32
      %40 = vector.broadcast %cst_16 : f32 to vector<1x128xf32>
      %41 = arith.select %39, %15, %40 : vector<1x128xi1>, vector<1x128xf32>
      %cst_17 = arith.constant dense<0.000000e+00> : vector<128xf32>
      %42 = vector.multi_reduction <add>, %41, %cst_17 [0] : vector<1x128xf32> to vector<128xf32>
      %43 = vector.shape_cast %42 : vector<128xf32> to vector<1x128xf32>
      %44 = arith.addf %37, %43 : vector<1x128xf32>
      %c0_18 = arith.constant 0 : index
      %c0_19 = arith.constant 0 : index
      %45 = vector.load %arg5[%c0_18, %c0_19] : memref<1x128xf32, #tpu.memory_space<vmem>>, vector<1x128xf32>
      tpu.vector_store %arg5[%c0_18, %c0_19], %44 {strides = array<i32>} : memref<1x128xf32, #tpu.memory_space<vmem>>, vector<1x128xf32>,
    } else {
    }
    %c0_i32_10 = arith.constant 0 : i32
    %27 = arith.cmpi eq, %arg1, %c0_i32_10 : i32
    %28 = arith.extui %27 : i1 to i32
    %c0_i32_11 = arith.constant 0 : i32
    %29 = arith.cmpi ne, %28, %c0_i32_11 : i32
    scf.if %29 {
      %30 = tpu.iota {dimensions = array<i32: 0>} : vector<8x128xi32>
      %c0_i32_12 = arith.constant 0 : i32
      %31 = vector.broadcast %c0_i32_12 : i32 to vector<8x128xi32>
      %32 = arith.cmpi eq, %30, %31 : vector<8x128xi32>
      %c0_13 = arith.constant 0 : index
      %c0_14 = arith.constant 0 : index
      %33 = vector.load %arg5[%c0_13, %c0_14] : memref<1x128xf32, #tpu.memory_space<vmem>>, vector<1x128xf32>
      %cst_15 = arith.constant 0.000000e+00 : f32
      %34 = vector.shape_cast %33 : vector<1x128xf32> to vector<1x128xf32>
      %35 = vector.broadcast %34 : vector<1x128xf32> to vector<8x128xf32>
      %36 = vector.broadcast %cst_15 : f32 to vector<8x128xf32>
      %37 = arith.select %32, %35, %36 : vector<8x128xi1>, vector<8x128xf32>
      %c0_16 = arith.constant 0 : index
      %c0_17 = arith.constant 0 : index
      %38 = vector.load %arg4[%c0_16, %c0_17] : memref<8x128xf32, #tpu.memory_space<vmem>>, vector<8x128xf32>
      tpu.vector_store %arg4[%c0_16, %c0_17], %37 {strides = array<i32>} : memref<8x128xf32, #tpu.memory_space<vmem>>, vector<8x128xf32>,
    } else {
    }
    return
  }
  func.func @transform_0(%arg0: i32, %arg1: i32) -> (i32, i32) {
    %c1_i32 = arith.constant 1 : i32
    %0 = arith.muli %arg0, %c1_i32 : i32
    %1 = arith.addi %0, %arg1 : i32
    %c0_i32 = arith.constant 0 : i32
    %2 = arith.minsi %1, %c0_i32 : i32
    %c0_i32_0 = arith.constant 0 : i32
    %c0_i32_1 = arith.constant 0 : i32
    return %2, %c0_i32_0 : i32, i32
  }
  func.func @transform_1(%arg0: i32, %arg1: i32) -> (i32, i32) {
    %c1_i32 = arith.constant 1 : i32
    %0 = arith.muli %arg0, %c1_i32 : i32
    %1 = arith.addi %0, %arg1 : i32
    %c0_i32 = arith.constant 0 : i32
    %2 = arith.minsi %1, %c0_i32 : i32
    %c0_i32_0 = arith.constant 0 : i32
    %c0_i32_1 = arith.constant 0 : i32
    return %2, %c0_i32_0 : i32, i32
  }
  func.func @transform_2(%arg0: i32, %arg1: i32) -> (i32, i32) {
    %c0_i32 = arith.constant 0 : i32
    %c0_i32_0 = arith.constant 0 : i32
    return %arg0, %c0_i32 : i32, i32
  }
}

</mosaic_0001>

<bundles_post_ra>
// kernel: tpu_custom_call.1
= control target key start
LH: loop header
LB: loop body
LE: loop exit
PB: predicated region body
PF: predicated region fallthrough
CT: control target
= control target key end

     0   :  { %7 = vsyncpa [#allocation4], 0  ;;  %s255_s0 = inlined_call_operand.hbm [shape: f32[1,128], index: 0, kind: input, shape index: {}]   ;;  %s256_s1 = inlined_call_operand.hbm [shape: bf16[1,128], index: 1, kind: input, shape index: {}]   ;;  %s257_s2 = inlined_call_operand.hbm [shape: f32[8,128], index: 2, kind: output, shape index: {}]  }
   0x1   :  { %8 = vsyncpa [#allocation7], 0 }
   0x2   :  { %9 = vsyncpa [#allocation5], 0  ;;  %s19_s11 = sshll.u32 %s255_s0, 4  ;;  %s227_s12 = smov [#allocation3]   ;;  %s20_s11 = int_to_ptr.hbm [resolvable:$true] %s19_s11 }
   0x3   :  { %s21_s13 = sshll.u32 %s227_s12, 4  ;;  %s34_s16 = sshll.u32 %s256_s1, 4  ;;  %s22_s13 = int_to_ptr.vmem [resolvable:$true] %s21_s13  ;;  %s35_s16 = int_to_ptr.hbm [resolvable:$true] %s34_s16 }
   0x4   :  { %24 = dma.hbm_to_vmem [thread:$0]  %s20_s11, 16, %s22_s13, [#allocation4]  }
   0x5   :  { %s228_s17 = smov [#allocation6]  }
   0x6   :  { %s36_s18 = sshll.u32 %s228_s17, 4  ;;  %s37_s18 = int_to_ptr.vmem [resolvable:$true] %s36_s18 }
   0x7   :  { %39 = dma.hbm_to_vmem [thread:$0]  %s35_s16, 16, %s37_s18, [#allocation7]  }
   0x8   :  { %221 = dma.done.wait [#allocation4], 16  }
   0x9   :  { %222 = vsyncadd [#allocation4], 4294967280 }
   0xa   :  { %223 = dma.done.wait [#allocation7], 16  }
   0xb   :  { %224 = vsyncadd [#allocation7], 4294967280  ;;  %v229_v0 = vmov 0.0   ;;  %v59_v1 = vld [vmem:[#allocation3] sm:$0x1]  ;;  %v94_v5 = vlaneseq  ;;  %s230_s0 = smov [#allocation8]  }
   0xc   :  { %58 = vst [vmem:[#allocation2] sm:$0x1] %v229_v0  ;;  %v65_v2 = vand.u32 2147483647, %v59_v1  ;;  %v60_v6 = vld [vmem:[#allocation6] sm:$0x1] }
   0xd   :  { %v95_v8 = vshrl.u32 %v94_v5, 7  ;;  %v61_v9 = vunpack.c.l.bf16 %v60_v6  ;;  %v97_v13 = vand.u32 127, %v94_v5  ;;  %v62_v15 = vmax.f32 %v59_v1, 0.0  ;;  %s125_s1 = sshll.u32 %s230_s0, 4  ;;  %s127_s21 = sshll.u32 %s257_s2, 4  ;;  %s126_s1 = int_to_ptr.vmem [resolvable:$true] %s125_s1  ;;  %s128_s21 = int_to_ptr.hbm [resolvable:$true] %s127_s21 }
   0xe   :  { %v66_v3 = vsub.f32 0.0, %v65_v2 }
   0xf   :  { %v98_v14 = vmul.u32 128, %v95_v8  ;;  %v63_v16 = vmul.f32 %v61_v9, %v59_v1  ;;  %vm113_vm2 = vcmp.eq.s32.totalorder %v95_v8, 0 }
  0x10   :  { %v67_v4 = vmul.f32 1.442695, %v66_v3 }
  0x11   :  { %v101_v19 = vadd.s32 %v98_v14, %v97_v13  ;;  %v64_v21 = vsub.f32 %v62_v15, %v63_v16 }
  0x12   :  { %145 = vpow2.f32 %v67_v4 }
  0x13   :  { %vm103_vm1 = vcmp.lt.s32.totalorder %v101_v19, 8  ;;  %v102_v25 = vld [vmem:[#allocation2] sm:$0x1] }
  0x18   :  { %v146_v7 = vpop.eup %145 }
  0x19   :  { %v69_v10 = vadd.f32 1.0, %v146_v7  ;;  %v72_v11 = vmul.f32 -0.5, %v146_v7  ;;  %v75_v17 = vand.u32 2147483647, %v146_v7 }
  0x1b   :  { %147 = vlog2.f32 %v69_v10  ;;  %v73_v12 = vadd.f32 1.0, %v72_v11  ;;  %vm76_vm0 = vcmp.lt.f32.partialorder %v75_v17, 0.0004427343 }
  0x1d   :  { %v74_v18 = vmul.f32 %v146_v7, %v73_v12 }
  0x21   :  { %v148_v20 = vpop.eup %147 }
  0x22   :  { %v71_v22 = vmul.f32 0.6931472, %v148_v20 }
  0x24   :  { %v77_v23 = vsel %vm76_vm0, %v74_v18, %v71_v22 }
  0x25   :  { %v78_v24 = vadd.f32 %v77_v23, %v64_v21 }
  0x27   :  { %v104_v26 = vsel %vm103_vm1, %v78_v24, 0.0 }
  0x28   :  { %v106_v27 = vadd.f32 %v104_v26, %v102_v25 }
  0x2a   :  { %107 = vst [vmem:[#allocation2] sm:$0x1] %v106_v27 }
  0x31   :  { %v144_v28 = vld [vmem:[#allocation2] ss:$0 sm:$0xff] }
  0x32   :  { %v118_v29 = vsel %vm113_vm2, %v144_v28, 0.0 }
  0x33   :  { %119 = vst [vmem:[#allocation8] sm:$0xff] %v118_v29 }
  0x34   :  { %130 = dma.vmem_to_hbm [thread:$0]  %s126_s1, 128, %s128_s21, [#allocation5]  }
  0x35   :  { %225 = dma.done.wait [#allocation5], 128  }
  0x36   :  { %226 = vsyncadd [#allocation5], 4294967168 }
  0x37   :  { %135 = vsyncpa [#allocation4], 1 }
  0x38   :  { %136 = vsyncpa [#allocation7], 1 }
  0x39   :  { %137 = vsyncpa [#allocation5], 1 }

</bundles_post_ra>
